<compile_context>
chip_gen: v7x
topology: tpu7x:2x2x1
jax: 0.10.0
libtpu: 0.0.40
codegen_flags: <defaults>
</compile_context>

<pallas_src>
import jax
import jax.numpy as jnp
from jax.experimental import pallas as pl
from jax.experimental.pallas import tpu as pltpu
import numpy as np

# ----------------------------- config (small) -----------------------------
B = 2          # batch
S = 8          # sequence length (before CLS)
E = 32         # enc.embed_size
H = 64         # MLP hidden size
S1 = S + 1     # sequence length after CLS prepend


# ----------------------------- Pallas kernel ------------------------------
def _cls_encoder_kernel(cls_ref, x_ref, wqkv_ref, wo_ref, w1_ref, w2_ref,
                        b12_ref, o_ref):
    # cls_ref: (1, E)         shared CLS row
    # x_ref:   (B*S, E)       all non-CLS tokens, flattened
    # wqkv:    (E, 3E)        [Wq*1/sqrt(E) | Wk | Wv]
    # b12:     (1, H+E)       [b1 | b2]
    # o_ref:   (B, E)         encoder output at the CLS position
    n_rows, e = x_ref.shape
    bsz, _ = o_ref.shape
    seq = n_rows // bsz
    hdim = w1_ref.shape[1]

    cls = cls_ref[...].astype(jnp.float32)                           # (1, E)
    x = x_ref[...].astype(jnp.float32)                               # (B*S, E)
    wqkv = wqkv_ref[...]

    # Fused QKV projection (scale already folded into the Q columns).
    qkv_c = jnp.dot(cls, wqkv, preferred_element_type=jnp.float32)   # (1, 3E)
    qkv_x = jnp.dot(x, wqkv, preferred_element_type=jnp.float32)     # (B*S, 3E)

    q0 = qkv_c[:, 0:e]            # (1, E)  CLS query (identical for all batches)
    k_c = qkv_c[:, e:2 * e]       # (1, E)
    v_c = qkv_c[:, 2 * e:]        # (1, E)
    k_x = qkv_x[:, e:2 * e]       # (B*S, E)
    v_x = qkv_x[:, 2 * e:]        # (B*S, E)

    # Score of the CLS query against the CLS key (shared across the batch).
    s_c = jnp.sum(q0 * k_c, axis=-1, keepdims=True)                  # (1, 1)

    # Tiny static unroll over the batch for the per-sequence softmax/context.
    ctx_rows = []
    for bi in range(bsz):
        k_b = k_x[bi * seq:(bi + 1) * seq, :]                        # (S, E)
        v_b = v_x[bi * seq:(bi + 1) * seq, :]                        # (S, E)
        s_b = jnp.dot(q0, k_b.T, preferred_element_type=jnp.float32)  # (1, S)
        scores = jnp.concatenate([s_c, s_b], axis=-1)                # (1, S1)
        m = scores.max(axis=-1, keepdims=True)
        p = jnp.exp(scores - m)
        attn = p * pl.reciprocal(p.sum(axis=-1, keepdims=True), approx=True)
        ctx_b = attn[:, 0:1] * v_c + jnp.dot(
            attn[:, 1:], v_b, preferred_element_type=jnp.float32)    # (1, E)
        ctx_rows.append(ctx_b)
    ctx = jnp.concatenate(ctx_rows, axis=0)                          # (B, E)

    # Only the CLS row is consumed downstream -> project / MLP just that row.
    x0 = cls + jnp.dot(ctx, wo_ref[...], preferred_element_type=jnp.float32)  # (B, E)
    b1 = b12_ref[:, 0:hdim]                                          # (1, H)
    b2 = b12_ref[:, hdim:]                                           # (1, E)
    hid = jax.nn.gelu(
        jnp.dot(x0, w1_ref[...], preferred_element_type=jnp.float32) + b1)
    out = x0 + jnp.dot(hid, w2_ref[...], preferred_element_type=jnp.float32) + b2
    o_ref[...] = out.astype(o_ref.dtype)


# ------------------------- ClsOutEncoder forward --------------------------
def cls_out_encoder_forward(x, cls_token, params):
    """x: (B, S, E).  Returns (B, E): encoder output at the CLS position."""
    wq, wk, wv, wo, w1, b1, w2, b2 = params
    b, s, e = x.shape
    hdim = w1.shape[1]

    # Trace-time fusion: one QKV weight (1/sqrt(E) folded into Wq), one bias buf.
    scale = float(1.0 / np.sqrt(e))
    wqkv = jnp.concatenate([wq * scale, wk, wv], axis=1)             # (E, 3E)
    b12 = jnp.concatenate([b1, b2], axis=1)                          # (1, H+E)
    cls2d = cls_token.reshape(1, e)                                  # free reshape
    x2d = x.reshape(b * s, e)                                        # free reshape

    def full_spec(arr):
        nd = arr.ndim
        return pl.BlockSpec(arr.shape, lambda i, nd=nd: (0,) * nd)

    return pl.pallas_call(
        _cls_encoder_kernel,
        out_shape=jax.ShapeDtypeStruct((b, e), x.dtype),
        grid_spec=pltpu.PrefetchScalarGridSpec(
            num_scalar_prefetch=0,
            grid=(1,),                                   # single invocation
            in_specs=[full_spec(cls2d), full_spec(x2d), full_spec(wqkv),
                      full_spec(wo), full_spec(w1), full_spec(w2),
                      full_spec(b12)],
            out_specs=pl.BlockSpec((b, e), lambda i: (0, 0)),
        ),
        compiler_params=pltpu.CompilerParams(
            dimension_semantics=("arbitrary",)),
    )(cls2d, x2d, wqkv, wo, w1, w2, b12)


# ----------------------------- pure-JAX reference --------------------------
def _reference(x, cls_token, params):
    wq, wk, wv, wo, w1, b1, w2, b2 = params
    b = x.shape[0]
    e = x.shape[-1]
    cls = jnp.broadcast_to(cls_token, (b,) + cls_token.shape[1:])
    h = jnp.concatenate([cls, x], axis=1).astype(jnp.float32)        # (B, S1, E)
    q = h @ wq; k = h @ wk; v = h @ wv
    scores = jnp.einsum('bqe,bke->bqk', q, k) / np.sqrt(e)
    attn = jax.nn.softmax(scores, axis=-1)
    h = h + jnp.einsum('bqk,bke->bqe', attn, v) @ wo
    m = jax.nn.gelu(h @ w1 + b1)
    h = h + m @ w2 + b2
    return h[:, 0]


# --------------------------------- main ------------------------------------
if __name__ == "__main__":
    key = jax.random.PRNGKey(0)
    keys = jax.random.split(key, 10)

    # deterministic parameter init (shapes implied by the module / chosen enc)
    cls_token = jax.random.normal(keys[0], (1, 1, E), jnp.float32)   # nn.Parameter(randn(1,1,E))
    wq = jax.random.normal(keys[1], (E, E), jnp.float32) * 0.05
    wk = jax.random.normal(keys[2], (E, E), jnp.float32) * 0.05
    wv = jax.random.normal(keys[3], (E, E), jnp.float32) * 0.05
    wo = jax.random.normal(keys[4], (E, E), jnp.float32) * 0.05
    w1 = jax.random.normal(keys[5], (E, H), jnp.float32) * 0.05
    b1 = jax.random.normal(keys[6], (1, H), jnp.float32) * 0.05
    w2 = jax.random.normal(keys[7], (H, E), jnp.float32) * 0.05
    b2 = jax.random.normal(keys[8], (1, E), jnp.float32) * 0.05
    params = (wq, wk, wv, wo, w1, b1, w2, b2)

    x = jax.random.normal(keys[9], (B, S, E), jnp.float32)

    out = cls_out_encoder_forward(x, cls_token, params)
    out = jax.block_until_ready(out)
    assert out.shape == (B, E), out.shape

    ref = _reference(x, cls_token, params)
    np.testing.assert_allclose(np.asarray(out), np.asarray(ref),
                               rtol=1e-3, atol=1e-3)

    print("KERNEL_OK")
</pallas_src>

<mosaic_0001>
module attributes {stable_mosaic.version = 11 : i64} {
  func.func @_cls_encoder_kernel(%arg0: i32, %arg1: memref<1x32xf32, #tpu.memory_space<vmem>>, %arg2: memref<16x32xf32, #tpu.memory_space<vmem>>, %arg3: memref<32x96xf32, #tpu.memory_space<vmem>>, %arg4: memref<32x32xf32, #tpu.memory_space<vmem>>, %arg5: memref<32x64xf32, #tpu.memory_space<vmem>>, %arg6: memref<64x32xf32, #tpu.memory_space<vmem>>, %arg7: memref<1x96xf32, #tpu.memory_space<vmem>>, %arg8: memref<2x32xf32, #tpu.memory_space<vmem>>) attributes {dimension_semantics = [#tpu.dimension_semantics<arbitrary>], iteration_bounds = array<i64: 1>, scalar_prefetch = 0 : i64, scratch_operands = 0 : i64, tpu.core_type = #tpu.core_type<tc>, window_params = [{pipeline_mode = #tpu.pipeline_mode<synchronous>, transform_indices = @transform_0, window_bounds = array<i64: 1, 32>}, {pipeline_mode = #tpu.pipeline_mode<synchronous>, transform_indices = @transform_1, window_bounds = array<i64: 16, 32>}, {pipeline_mode = #tpu.pipeline_mode<synchronous>, transform_indices = @transform_2, window_bounds = array<i64: 32, 96>}, {pipeline_mode = #tpu.pipeline_mode<synchronous>, transform_indices = @transform_3, window_bounds = array<i64: 32, 32>}, {pipeline_mode = #tpu.pipeline_mode<synchronous>, transform_indices = @transform_4, window_bounds = array<i64: 32, 64>}, {pipeline_mode = #tpu.pipeline_mode<synchronous>, transform_indices = @transform_5, window_bounds = array<i64: 64, 32>}, {pipeline_mode = #tpu.pipeline_mode<synchronous>, transform_indices = @transform_6, window_bounds = array<i64: 1, 96>}, {pipeline_mode = #tpu.pipeline_mode<synchronous>, transform_indices = @transform_7, window_bounds = array<i64: 2, 32>}]} {
    %c0 = arith.constant 0 : index
    %c0_0 = arith.constant 0 : index
    %0 = vector.load %arg1[%c0, %c0_0] : memref<1x32xf32, #tpu.memory_space<vmem>>, vector<1x32xf32>
    %c0_1 = arith.constant 0 : index
    %c0_2 = arith.constant 0 : index
    %1 = vector.load %arg2[%c0_1, %c0_2] : memref<16x32xf32, #tpu.memory_space<vmem>>, vector<16x32xf32>
    %c0_3 = arith.constant 0 : index
    %c0_4 = arith.constant 0 : index
    %2 = vector.load %arg3[%c0_3, %c0_4] : memref<32x96xf32, #tpu.memory_space<vmem>>, vector<32x96xf32>
    %cst = arith.constant dense<0.000000e+00> : vector<1x96xf32>
    %3 = tpu.matmul %0, %2, %cst {dimension_numbers = #tpu.dot_dimension_numbers<[1], [0], [0], [1], [0, 0, 1, 1], [], []>} : vector<1x32xf32>, vector<32x96xf32>, vector<1x96xf32> -> vector<1x96xf32>
    %cst_5 = arith.constant dense<0.000000e+00> : vector<16x96xf32>
    %4 = tpu.matmul %1, %2, %cst_5 {dimension_numbers = #tpu.dot_dimension_numbers<[1], [0], [0], [1], [0, 0, 1, 1], [], []>} : vector<16x32xf32>, vector<32x96xf32>, vector<16x96xf32> -> vector<16x96xf32>
    %5 = vector.extract_strided_slice %3 {offsets = [0, 0], sizes = [1, 32], strides = [1, 1]} : vector<1x96xf32> to vector<1x32xf32>
    %6 = vector.extract_strided_slice %3 {offsets = [0, 32], sizes = [1, 32], strides = [1, 1]} : vector<1x96xf32> to vector<1x32xf32>
    %7 = vector.extract_strided_slice %3 {offsets = [0, 64], sizes = [1, 32], strides = [1, 1]} : vector<1x96xf32> to vector<1x32xf32>
    %8 = vector.extract_strided_slice %4 {offsets = [0, 32], sizes = [16, 32], strides = [1, 1]} : vector<16x96xf32> to vector<16x32xf32>
    %9 = vector.extract_strided_slice %4 {offsets = [0, 64], sizes = [16, 32], strides = [1, 1]} : vector<16x96xf32> to vector<16x32xf32>
    %10 = arith.mulf %5, %6 : vector<1x32xf32>
    %cst_6 = arith.constant dense<0.000000e+00> : vector<1xf32>
    %11 = vector.multi_reduction <add>, %10, %cst_6 [1] : vector<1x32xf32> to vector<1xf32>
    %12 = vector.shape_cast %11 : vector<1xf32> to vector<1x1xf32>
    %13 = vector.extract_strided_slice %8 {offsets = [0, 0], sizes = [8, 32], strides = [1, 1]} : vector<16x32xf32> to vector<8x32xf32>
    %14 = vector.extract_strided_slice %9 {offsets = [0, 0], sizes = [8, 32], strides = [1, 1]} : vector<16x32xf32> to vector<8x32xf32>
    %15 = tpu.transpose %13, [1, 0] : vector<8x32xf32> -> vector<32x8xf32>
    %cst_7 = arith.constant dense<0.000000e+00> : vector<1x8xf32>
    %16 = tpu.matmul %5, %15, %cst_7 {dimension_numbers = #tpu.dot_dimension_numbers<[1], [0], [0], [1], [0, 0, 1, 1], [], []>} : vector<1x32xf32>, vector<32x8xf32>, vector<1x8xf32> -> vector<1x8xf32>
    %17 = tpu.concatenate %12, %16 in 1 : vector<1x1xf32>, vector<1x8xf32> -> vector<1x9xf32>
    %cst_8 = arith.constant dense<0xFF800000> : vector<1xf32>
    %18 = vector.multi_reduction <maximumf>, %17, %cst_8 [1] : vector<1x9xf32> to vector<1xf32>
    %19 = vector.shape_cast %18 : vector<1xf32> to vector<1x1xf32>
    %20 = vector.broadcast %19 : vector<1x1xf32> to vector<1x9xf32>
    %21 = arith.subf %17, %20 : vector<1x9xf32>
    %22 = math.exp %21 : vector<1x9xf32>
    %cst_9 = arith.constant dense<0.000000e+00> : vector<1xf32>
    %23 = vector.multi_reduction <add>, %22, %cst_9 [1] : vector<1x9xf32> to vector<1xf32>
    %24 = vector.shape_cast %23 : vector<1xf32> to vector<1x1xf32>
    %25 = tpu.reciprocal %24 {approx = true} : vector<1x1xf32> -> vector<1x1xf32>
    %26 = vector.broadcast %25 : vector<1x1xf32> to vector<1x9xf32>
    %27 = arith.mulf %22, %26 : vector<1x9xf32>
    %28 = vector.extract_strided_slice %27 {offsets = [0, 0], sizes = [1, 1], strides = [1, 1]} : vector<1x9xf32> to vector<1x1xf32>
    %29 = vector.broadcast %28 : vector<1x1xf32> to vector<1x32xf32>
    %30 = arith.mulf %29, %7 : vector<1x32xf32>
    %31 = vector.extract_strided_slice %27 {offsets = [0, 1], sizes = [1, 8], strides = [1, 1]} : vector<1x9xf32> to vector<1x8xf32>
    %cst_10 = arith.constant dense<0.000000e+00> : vector<1x32xf32>
    %32 = tpu.matmul %31, %14, %cst_10 {dimension_numbers = #tpu.dot_dimension_numbers<[1], [0], [0], [1], [0, 0, 1, 1], [], []>} : vector<1x8xf32>, vector<8x32xf32>, vector<1x32xf32> -> vector<1x32xf32>
    %33 = arith.addf %30, %32 : vector<1x32xf32>
    %34 = vector.extract_strided_slice %8 {offsets = [8, 0], sizes = [8, 32], strides = [1, 1]} : vector<16x32xf32> to vector<8x32xf32>
    %35 = vector.extract_strided_slice %9 {offsets = [8, 0], sizes = [8, 32], strides = [1, 1]} : vector<16x32xf32> to vector<8x32xf32>
    %36 = tpu.transpose %34, [1, 0] : vector<8x32xf32> -> vector<32x8xf32>
    %cst_11 = arith.constant dense<0.000000e+00> : vector<1x8xf32>
    %37 = tpu.matmul %5, %36, %cst_11 {dimension_numbers = #tpu.dot_dimension_numbers<[1], [0], [0], [1], [0, 0, 1, 1], [], []>} : vector<1x32xf32>, vector<32x8xf32>, vector<1x8xf32> -> vector<1x8xf32>
    %38 = tpu.concatenate %12, %37 in 1 : vector<1x1xf32>, vector<1x8xf32> -> vector<1x9xf32>
    %cst_12 = arith.constant dense<0xFF800000> : vector<1xf32>
    %39 = vector.multi_reduction <maximumf>, %38, %cst_12 [1] : vector<1x9xf32> to vector<1xf32>
    %40 = vector.shape_cast %39 : vector<1xf32> to vector<1x1xf32>
    %41 = vector.broadcast %40 : vector<1x1xf32> to vector<1x9xf32>
    %42 = arith.subf %38, %41 : vector<1x9xf32>
    %43 = math.exp %42 : vector<1x9xf32>
    %cst_13 = arith.constant dense<0.000000e+00> : vector<1xf32>
    %44 = vector.multi_reduction <add>, %43, %cst_13 [1] : vector<1x9xf32> to vector<1xf32>
    %45 = vector.shape_cast %44 : vector<1xf32> to vector<1x1xf32>
    %46 = tpu.reciprocal %45 {approx = true} : vector<1x1xf32> -> vector<1x1xf32>
    %47 = vector.broadcast %46 : vector<1x1xf32> to vector<1x9xf32>
    %48 = arith.mulf %43, %47 : vector<1x9xf32>
    %49 = vector.extract_strided_slice %48 {offsets = [0, 0], sizes = [1, 1], strides = [1, 1]} : vector<1x9xf32> to vector<1x1xf32>
    %50 = vector.broadcast %49 : vector<1x1xf32> to vector<1x32xf32>
    %51 = arith.mulf %50, %7 : vector<1x32xf32>
    %52 = vector.extract_strided_slice %48 {offsets = [0, 1], sizes = [1, 8], strides = [1, 1]} : vector<1x9xf32> to vector<1x8xf32>
    %cst_14 = arith.constant dense<0.000000e+00> : vector<1x32xf32>
    %53 = tpu.matmul %52, %35, %cst_14 {dimension_numbers = #tpu.dot_dimension_numbers<[1], [0], [0], [1], [0, 0, 1, 1], [], []>} : vector<1x8xf32>, vector<8x32xf32>, vector<1x32xf32> -> vector<1x32xf32>
    %54 = arith.addf %51, %53 : vector<1x32xf32>
    %55 = tpu.concatenate %33, %54 in 0 : vector<1x32xf32>, vector<1x32xf32> -> vector<2x32xf32>
    %c0_15 = arith.constant 0 : index
    %c0_16 = arith.constant 0 : index
    %56 = vector.load %arg4[%c0_15, %c0_16] : memref<32x32xf32, #tpu.memory_space<vmem>>, vector<32x32xf32>
    %cst_17 = arith.constant dense<0.000000e+00> : vector<2x32xf32>
    %57 = tpu.matmul %55, %56, %cst_17 {dimension_numbers = #tpu.dot_dimension_numbers<[1], [0], [0], [1], [0, 0, 1, 1], [], []>} : vector<2x32xf32>, vector<32x32xf32>, vector<2x32xf32> -> vector<2x32xf32>
    %58 = vector.broadcast %0 : vector<1x32xf32> to vector<2x32xf32>
    %59 = arith.addf %58, %57 : vector<2x32xf32>
    %c0_18 = arith.constant 0 : index
    %c0_19 = arith.constant 0 : index
    %60 = vector.load %arg7[%c0_18, %c0_19] : memref<1x96xf32, #tpu.memory_space<vmem>>, vector<1x64xf32>
    %c0_20 = arith.constant 0 : index
    %c64 = arith.constant 64 : index
    %61 = vector.load %arg7[%c0_20, %c64] : memref<1x96xf32, #tpu.memory_space<vmem>>, vector<1x32xf32>
    %c0_21 = arith.constant 0 : index
    %c0_22 = arith.constant 0 : index
    %62 = vector.load %arg5[%c0_21, %c0_22] : memref<32x64xf32, #tpu.memory_space<vmem>>, vector<32x64xf32>
    %cst_23 = arith.constant dense<0.000000e+00> : vector<2x64xf32>
    %63 = tpu.matmul %59, %62, %cst_23 {dimension_numbers = #tpu.dot_dimension_numbers<[1], [0], [0], [1], [0, 0, 1, 1], [], []>} : vector<2x32xf32>, vector<32x64xf32>, vector<2x64xf32> -> vector<2x64xf32>
    %64 = vector.broadcast %60 : vector<1x64xf32> to vector<2x64xf32>
    %65 = arith.addf %63, %64 : vector<2x64xf32>
    %66 = arith.mulf %65, %65 : vector<2x64xf32>
    %67 = arith.mulf %65, %66 : vector<2x64xf32>
    %cst_24 = arith.constant 4.471500e-02 : f32
    %68 = vector.broadcast %cst_24 : f32 to vector<2x64xf32>
    %69 = arith.mulf %68, %67 : vector<2x64xf32>
    %70 = arith.addf %65, %69 : vector<2x64xf32>
    %cst_25 = arith.constant 0.797884583 : f32
    %71 = vector.broadcast %cst_25 : f32 to vector<2x64xf32>
    %72 = arith.mulf %71, %70 : vector<2x64xf32>
    %73 = math.tanh %72 : vector<2x64xf32>
    %cst_26 = arith.constant 1.000000e+00 : f32
    %74 = vector.broadcast %cst_26 : f32 to vector<2x64xf32>
    %75 = arith.addf %74, %73 : vector<2x64xf32>
    %cst_27 = arith.constant 5.000000e-01 : f32
    %76 = vector.broadcast %cst_27 : f32 to vector<2x64xf32>
    %77 = arith.mulf %76, %75 : vector<2x64xf32>
    %78 = arith.mulf %65, %77 : vector<2x64xf32>
    %c0_28 = arith.constant 0 : index
    %c0_29 = arith.constant 0 : index
    %79 = vector.load %arg6[%c0_28, %c0_29] : memref<64x32xf32, #tpu.memory_space<vmem>>, vector<64x32xf32>
    %cst_30 = arith.constant dense<0.000000e+00> : vector<2x32xf32>
    %80 = tpu.matmul %78, %79, %cst_30 {dimension_numbers = #tpu.dot_dimension_numbers<[1], [0], [0], [1], [0, 0, 1, 1], [], []>} : vector<2x64xf32>, vector<64x32xf32>, vector<2x32xf32> -> vector<2x32xf32>
    %81 = arith.addf %59, %80 : vector<2x32xf32>
    %82 = vector.broadcast %61 : vector<1x32xf32> to vector<2x32xf32>
    %83 = arith.addf %81, %82 : vector<2x32xf32>
    %c0_31 = arith.constant 0 : index
    %c0_32 = arith.constant 0 : index
    %84 = vector.load %arg8[%c0_31, %c0_32] : memref<2x32xf32, #tpu.memory_space<vmem>>, vector<2x32xf32>
    tpu.vector_store %arg8[%c0_31, %c0_32], %83 {strides = array<i32>} : memref<2x32xf32, #tpu.memory_space<vmem>>, vector<2x32xf32>,
    return
  }
  func.func @transform_0(%arg0: i32) -> (i32, i32) {
    %c0_i32 = arith.constant 0 : i32
    %c0_i32_0 = arith.constant 0 : i32
    %c0_i32_1 = arith.constant 0 : i32
    return %c0_i32, %c0_i32_0 : i32, i32
  }
  func.func @transform_1(%arg0: i32) -> (i32, i32) {
    %c0_i32 = arith.constant 0 : i32
    %c0_i32_0 = arith.constant 0 : i32
    %c0_i32_1 = arith.constant 0 : i32
    return %c0_i32, %c0_i32_0 : i32, i32
  }
  func.func @transform_2(%arg0: i32) -> (i32, i32) {
    %c0_i32 = arith.constant 0 : i32
    %c0_i32_0 = arith.constant 0 : i32
    %c0_i32_1 = arith.constant 0 : i32
    return %c0_i32, %c0_i32_0 : i32, i32
  }
  func.func @transform_3(%arg0: i32) -> (i32, i32) {
    %c0_i32 = arith.constant 0 : i32
    %c0_i32_0 = arith.constant 0 : i32
    %c0_i32_1 = arith.constant 0 : i32
    return %c0_i32, %c0_i32_0 : i32, i32
  }
  func.func @transform_4(%arg0: i32) -> (i32, i32) {
    %c0_i32 = arith.constant 0 : i32
    %c0_i32_0 = arith.constant 0 : i32
    %c0_i32_1 = arith.constant 0 : i32
    return %c0_i32, %c0_i32_0 : i32, i32
  }
  func.func @transform_5(%arg0: i32) -> (i32, i32) {
    %c0_i32 = arith.constant 0 : i32
    %c0_i32_0 = arith.constant 0 : i32
    %c0_i32_1 = arith.constant 0 : i32
    return %c0_i32, %c0_i32_0 : i32, i32
  }
  func.func @transform_6(%arg0: i32) -> (i32, i32) {
    %c0_i32 = arith.constant 0 : i32
    %c0_i32_0 = arith.constant 0 : i32
    %c0_i32_1 = arith.constant 0 : i32
    return %c0_i32, %c0_i32_0 : i32, i32
  }
  func.func @transform_7(%arg0: i32) -> (i32, i32) {
    %c0_i32 = arith.constant 0 : i32
    %c0_i32_0 = arith.constant 0 : i32
    %c0_i32_1 = arith.constant 0 : i32
    return %c0_i32, %c0_i32_0 : i32, i32
  }
}

</mosaic_0001>

<bundles_post_ra>
// kernel: tpu_custom_call.1
= control target key start
LH: loop header
LB: loop body
LE: loop exit
PB: predicated region body
PF: predicated region fallthrough
CT: control target
= control target key end

     0   :  { %12 = vsyncpa [#allocation3], 0  ;;  %s1364_s0 = inlined_call_operand.hbm [shape: f32[1,32], index: 0, kind: input, shape index: {}]   ;;  %s1365_s1 = inlined_call_operand.hbm [shape: f32[16,32], index: 1, kind: input, shape index: {}]   ;;  %s1366_s2 = inlined_call_operand.vmem [shape: f32[32,96], index: 2, kind: input, shape index: {}]   ;;  %s1367_s3 = inlined_call_operand.vmem [shape: f32[32,32], index: 3, kind: input, shape index: {}]   ;;  %s1368_s4 = inlined_call_operand.vmem [shape: f32[32,64], index: 4, kind: input, shape index: {}]   ;;  %s1369_s5 = inlined_call_operand.vmem [shape: f32[64,32], index: 5, kind: input, shape index: {}]   ;;  %s1370_s6 = inlined_call_operand.vmem [shape: f32[1,96], index: 6, kind: input, shape index: {}]   ;;  %s1371_s7 = inlined_call_operand.hbm [shape: f32[2,32], index: 7, kind: output, shape index: {}]  }
   0x1   :  { %13 = vsyncpa [#allocation6], 0 }
   0x2   :  { %14 = vsyncpa [#allocation4], 0  ;;  %s1144_s24 = smov [#allocation2]   ;;  %s1145_s26 = smov [#allocation5]  }
   0x3   :  { %s21_s25 = sshll.u32 %s1144_s24, 4  ;;  %s30_s27 = sshll.u32 %s1145_s26, 4  ;;  %s22_s25 = int_to_ptr.vmem [resolvable:$true] %s21_s25  ;;  %s1197_s27 = int_to_ptr.vmem [resolvable:$true] %s30_s27 }
   0x4   :  { %s1072_s30 = scalar_lea.hbm %s1364_s0, 16 }
   0x5   :  { %p1073_p0 = scmp.ne.s32.totalorder %s1364_s0, %s1072_s30  ;;  %p1076_p1 = scmp.lt.u32.totalorder %s1072_s30, %s1364_s0 }
   0x7   :  { %p1078_p2 = pnand %p1076_p1, %p1073_p0 }
   0x9   :  { %1081 = shalt.err (!%p1078_p2)
}
   0xa   :  { %s1082_s12 = scalar_lea.vmem %s22_s25, 16  ;;  %s1086_s13 = scalar_lea.vmem %s22_s25, 32 }
   0xb   :  { %p1083_p3 = scmp.ne.s32.totalorder %s22_s25, %s1082_s12  ;;  %p1087_p4 = scmp.lt.s32.totalorder %s22_s25, %s22_s25 }
   0xc   :  { %p1088_p5 = scmp.lt.s32.totalorder %s1086_s13, %s1082_s12 }
   0xe   :  { %p1089_p6 = por %p1088_p5, %p1087_p4 }
  0x10   :  { %p1090_p7 = pnand %p1089_p6, %p1083_p3 }
  0x12   :  { %1093 = shalt.err (!%p1090_p7)
}
  0x13   :  { %24 = dma.hbm_to_vmem [thread:$0]  %s1364_s0, 16, %s22_s25, [#allocation3]  }
  0x14   :  { %s1094_s18 = scalar_lea.hbm %s1365_s1, 256 }
  0x15   :  { %p1095_p8 = scmp.ne.s32.totalorder %s1365_s1, %s1094_s18  ;;  %p1098_p9 = scmp.lt.u32.totalorder %s1094_s18, %s1365_s1 }
  0x17   :  { %p1100_p10 = pnand %p1098_p9, %p1095_p8 }
  0x19   :  { %1103 = shalt.err (!%p1100_p10)
}
  0x1a   :  { %s1104_s23 = scalar_lea.vmem %s1197_s27, 256  ;;  %p1109_p12 = scmp.lt.s32.totalorder %s1197_s27, %s1197_s27 }
  0x1b   :  { %p1105_p11 = scmp.ne.s32.totalorder %s1197_s27, %s1104_s23  ;;  %p1110_p13 = scmp.lt.s32.totalorder %s1104_s23, %s1104_s23 }
  0x1d   :  { %p1111_p0 = por %p1110_p13, %p1109_p12 }
  0x1f   :  { %p1112_p1 = pnand %p1111_p0, %p1105_p11 }
  0x21   :  { %1115 = shalt.err (!%p1112_p1)
}
  0x22   :  { %s1146_s0 = smov 128   ;;  %s1147_s24 = smov 8  }
  0x23   :  { %36 = dma.hbm_to_vmem [thread:$0]  %s1365_s1, 256, %s1197_s27, [#allocation6], %s1146_s0, %s1146_s0, %s1147_s24  }
  0x24   :  { %1138 = dma.done.wait [#allocation3], 16  }
  0x25   :  { %1139 = vsyncadd [#allocation3], 4294967280 }
  0x26   :  { %1140 = dma.done.wait [#allocation6], 256  }
  0x27   :  { %1141 = vsyncadd [#allocation6], 4294967040  ;;  %v1148_v0 = vmov 0.0|0.0   ;;  %vm1149_vm0 = vmmov 0   ;;  %v1150_v1 = vmov 0.0   ;;  %v56_v2 = vld [vmem:[%s1366_s2] sm:$0xff] }
  0x28   :  { %1009 = vmatprep.subr.bf16.mxu1 %v1148_v0  ;;  %934 = vmatprep.mubr.msk.f32.mxu1 %vm1149_vm0, %v1150_v1  ;;  %v57_v3 = vld [vmem:[%s1366_s2 + $0x8] sm:$0xff]  ;;  %v58_v4 = vld [vmem:[%s1366_s2 + $0x10] sm:$0xff]  ;;  %v59_v6 = vld [vmem:[%s1366_s2 + $0x18] sm:$0xff]  ;;  %vm60_vm1 = vcmask 261120   ;;  %s1151_s2 = smov 96   ;;  %vm220_vm2 = vcmask 253952  }
  0x29   :  { %948 = vmatprep.subr.mxu0 %v1150_v1  ;;  %950 = vmatprep.mubr.msk.f32.mxu0 %vm1149_vm0, %v1150_v1  ;;  %v1010_v5 = vpack.c.bf16 %v57_v3, %v56_v2  ;;  %v1013_v7 = vpack.c.bf16 %v59_v6, %v58_v4  ;;  %v1247_v8 = vld [vmem:[#allocation2] sm:$0x1]  ;;  %v54_v9 = vld [vmem:[#allocation5] sm:$0xff]  ;;  %v55_v10 = vld [vmem:[#allocation5 + $0x8] sm:$0xff]  ;;  %s1152_s11 = smov 1   ;;  %vm305_vm3 = vcmask 7168  }
  0x2a   :  { %vm307_vm4 = vcmask 65536   ;;  %s1153_s12 = smov 64   ;;  %v1154_v41 = vmov 0   ;;  %s1155_s13 = smov 127   ;;  %vm330_vm5 = vcmask 64512   ;;  %v592_v52 = vld [vmem:[%s1367_s3] sm:$0xff] }
  0x2b   :  { %1011 = vmatpush3.bf16.msra.mxu1 %v1010_v5  ;;  %1060 = vset.pattern.permute.xlu0 %v1154_v41  ;;  %v593_v53 = vld [vmem:[%s1367_s3 + $0x8] sm:$0xff]  ;;  %v594_v54 = vld [vmem:[%s1367_s3 + $0x10] sm:$0xff]  ;;  %v595_v56 = vld [vmem:[%s1367_s3 + $0x18] sm:$0xff]  ;;  %vm590_vm6 = vcmask 1040384   ;;  %vm778_vm7 = vcmask 523264   ;;  %vm857_vm8 = vcmask 254976  }
  0x2c   :  { %1012 = vmatprep.subr.bf16.mxu1 %v1148_v0  ;;  %1061 = vset.pattern.permute.xlu1 %v1154_v41  ;;  %v1024_v55 = vpack.c.bf16 %v593_v53, %v592_v52  ;;  %v1027_v58 = vpack.c.bf16 %v595_v56, %v594_v54  ;;  %v678_v62 = vld [vmem:[%s1368_s4] sm:$0xff]  ;;  %v679_v63 = vld [vmem:[%s1368_s4 + $0x8] sm:$0xff] }
  0x2d   :  { %v1030_v2 = vpack.c.bf16 %v679_v63, %v678_v62 }
  0x2f   :  { %1014 = vmatpush3.bf16.msra.mxu1 %v1013_v7 }
  0x30   :  { %1016 = vmatprep.subr.bf16.mxu1 %v1010_v5 }
  0x32   :  { %935 = vmatmul.mubr.msk.f32.vlgmr.msra.gmra.mrb[0].mxu1 %vm60_vm1, %v1247_v8 }
  0x33   :  { %1018 = vmatpush3.bf16.msra.mxu1 %v1010_v5  ;;  %945 = vmatprep.mubr.msk.f32.mxu1 %vm60_vm1, %v54_v9 }
  0x34   :  { %1020 = vmatprep.subr.bf16.mxu1 %v1013_v7 }
  0x37   :  { %1022 = vmatpush3.bf16.msra.mxu1 %v1013_v7 }
  0x38   :  { %953 = vmatprep.subr.mxu1 %v1150_v1 }
  0x3a   :  { %946 = vmatmul.mubr.msk.f32.vlgmr.msra.gmra.mrb[2].mxu1 %vm60_vm1, %v55_v10 }
  0x3b   :  { %955 = vmatprep.mubr.msk.f32.mxu1 %vm1149_vm0, %v1150_v1 }
 0x105   :  { %v1256_v11 = vpop.f32.mrb[0].mxu1 }
 0x106   :  { %216 = vrot.lane.b32.xlu1 %v1256_v11, %s1151_s2  ;;  %v936_v12 = vpop.f32.mrb[1].mxu1 }
 0x10d   :  { %v947_v13 = vpop.f32.mrb[2].mxu1 }
 0x10e   :  { %v206_v14 = vpop.f32.mrb[3].mxu1 }
 0x10f   :  { %225 = vrot.lane.b32.xlu0 %v206_v14, %s1151_s2 }
 0x113   :  { %409 = vrot.lane.b32.xlu0 %v947_v13, %s1151_s2 }
 0x178   :  { %v217_v15 = vpop.permute.xlu1 %216 }
 0x179   :  { %v219_v16 = vmul.f32 %v217_v15, %v1256_v11 }
 0x17b   :  { %v221_v17 = vsel %vm220_vm2, %v219_v16, 0.0  ;;  %v680_v16 = vld [vmem:[%s1368_s4 + $0x10] sm:$0xff] }
 0x17c   :  { %222 = vadd.xlane.f32.xlu1 %v221_v17 }
 0x181   :  { %v226_v18 = vpop.permute.xlu0 %225 }
 0x182   :  { %949 = vmatpush3.xpose.msk.msra.mxu0 %vm60_vm1, %v226_v18  ;;  %v885_v18 = vld [vmem:[%s1370_s6] ss:$0 sm:$0xff] }
 0x183   :  { %958 = vmatprep.subr.mxu0 %v1150_v1 }
 0x185   :  { %951 = vmatmul.mubr.msk.f32.vlgmr.msra.gmra.mrb[0].mxu0 %vm60_vm1, %v1256_v11  ;;  %v410_v19 = vpop.permute.xlu0 %409 }
 0x186   :  { %959 = vmatpush3.xpose.msk.msra.mxu0 %vm60_vm1, %v410_v19  ;;  %960 = vmatprep.mubr.msk.f32.mxu0 %vm1149_vm0, %v1150_v1  ;;  %v671_v19 = vlaneseq }
 0x187   :  { %1023 = vmatprep.subr.bf16.mxu0 %v1148_v0 }
 0x189   :  { %961 = vmatmul.mubr.msk.f32.vlgmr.msra.gmra.mrb[2].mxu0 %vm60_vm1, %v1256_v11 }
 0x18a   :  { %976 = vmatprep.mubr.msk.f32.mxu0 %vm1149_vm0, %v1150_v1  ;;  %1025 = vmatpush3.bf16.msra.mxu0 %v1024_v55 }
 0x18b   :  { %1026 = vmatprep.subr.bf16.mxu0 %v1148_v0 }
 0x18e   :  { %1028 = vmatpush3.bf16.msra.mxu0 %v1027_v58 }
 0x18f   :  { %1035 = vmatprep.subr.bf16.mxu0 %v1148_v0 }
 0x209   :  { %v223_v24 = vpop.xlane.xlu1 %222 }
 0x258   :  { %v297_v20 = vpop.f32.mrb[0].mxu0 }
 0x259   :  { %302 = vrot.lane.b32.xlu0 %v297_v20, %s1152_s11  ;;  %v952_v21 = vpop.f32.mrb[1].mxu0  ;;  %v672_v20 = vshrl.u32 %v671_v19, 7 }
 0x25b   :  { %v673_v21 = vsub.s32 0, %v672_v20 }
 0x25c   :  { %v479_v22 = vpop.f32.mrb[2].mxu0 }
 0x25d   :  { %484 = vrot.lane.b32.xlu0 %v479_v22, %s1152_s11  ;;  %v962_v23 = vpop.f32.mrb[3].mxu0 }
 0x2cb   :  { %v303_v25 = vpop.permute.xlu0 %302 }
 0x2cc   :  { %v306_v26 = vsel %vm305_vm3, %v223_v24, %v303_v25  ;;  %v770_v25 = vld [vmem:[%s1369_s5] sm:$0xff] }
 0x2cd   :  { %v308_v27 = vsel %vm307_vm4, %v306_v26, -inf }
 0x2ce   :  { %309 = vmax.xlane.f32.xlu0 %v308_v27 }
 0x2cf   :  { %v485_v28 = vpop.permute.xlu0 %484 }
 0x2d0   :  { %v487_v29 = vsel %vm305_vm3, %v223_v24, %v485_v28  ;;  %v773_v28 = vld [vmem:[%s1369_s5 + $0x18] sm:$0xff] }
 0x2d1   :  { %v488_v30 = vsel %vm307_vm4, %v487_v29, -inf }
 0x2d2   :  { %489 = vmax.xlane.f32.xlu1 %v488_v30  ;;  %v774_v30 = vld [vmem:[%s1369_s5 + $0x20] sm:$0xff] }
 0x35b   :  { %v310_v31 = vpop.xlane.xlu0 %309 }
 0x35c   :  { %v311_v32 = vsub.f32 %v306_v26, %v310_v31  ;;  %v771_v26 = vld [vmem:[%s1369_s5 + $0x8] sm:$0xff] }
 0x35d   :  { %v1036_v27 = vpack.c.bf16 %v771_v26, %v770_v25  ;;  %v775_v31 = vld [vmem:[%s1369_s5 + $0x28] sm:$0xff] }
 0x35e   :  { %v312_v33 = vmul.f32 1.442695, %v311_v32  ;;  %v1042_v32 = vpack.c.bf16 %v775_v31, %v774_v30 }
 0x35f   :  { %v490_v34 = vpop.xlane.xlu1 %489 }
 0x360   :  { %1062 = vpow2.f32 %v312_v33  ;;  %v491_v35 = vsub.f32 %v487_v29, %v490_v34  ;;  %v776_v33 = vld [vmem:[%s1369_s5 + $0x30] sm:$0xff]  ;;  %v777_v34 = vld [vmem:[%s1369_s5 + $0x38] sm:$0xff] }
 0x362   :  { %v492_v36 = vmul.f32 1.442695, %v491_v35  ;;  %v1045_v35 = vpack.c.bf16 %v777_v34, %v776_v33 }
 0x364   :  { %1064 = vpow2.f32 %v492_v36 }
 0x36a   :  { %v1063_v37 = vpop.eup %1062 }
 0x36b   :  { %v314_v38 = vsel %vm307_vm4, %v1063_v37, 0.0 }
 0x36c   :  { %315 = vadd.xlane.f32.xlu1 %v314_v38 }
 0x36e   :  { %v1065_v39 = vpop.eup %1064 }
 0x36f   :  { %v494_v40 = vsel %vm307_vm4, %v1065_v39, 0.0 }
 0x370   :  { %495 = vadd.xlane.f32.xlu0 %v494_v40 }
 0x37d   :  { %327 = vrot.lane.b32.xlu1 %v206_v14, %s1153_s12 }
 0x381   :  { %507 = vrot.lane.b32.xlu1 %v947_v13, %s1153_s12 }
 0x3f9   :  { %v316_v42 = vpop.xlane.xlu1 %315 }
 0x3fa   :  { %1066 = vrcp.f32 %v316_v42 }
 0x3fd   :  { %v328_v43 = vpop.permute.xlu1 %327  ;;  %v496_v44 = vpop.xlane.xlu0 %495 }
 0x3fe   :  { %1068 = vrcp.f32 %v496_v44  ;;  %954 = vmatpush3.msra.mxu1 %v328_v43 }
 0x3ff   :  { %963 = vmatprep.subr.mxu1 %v1150_v1 }
 0x401   :  { %v508_v49 = vpop.permute.xlu1 %507 }
 0x404   :  { %v1067_v45 = vpop.eup %1066 }
 0x405   :  { %v318_v46 = vmul.f32 %v1067_v45, %v1063_v37 }
 0x407   :  { %325 = vrot.lane.b32.xlu0 %v318_v46, %s1155_s13 }
 0x408   :  { %v1069_v47 = vpop.eup %1068 }
 0x409   :  { %v498_v48 = vmul.f32 %v1069_v47, %v1065_v39 }
 0x40b   :  { %501 = vperm.xlu0 %1060, %v498_v48   ;;  %505 = vrot.lane.b32.xlu1 %v498_v48, %s1155_s13 }
 0x40f   :  { %321 = vperm.xlu1 %1061, %v318_v46  }
 0x479   :  { %v326_v50 = vpop.permute.xlu0 %325 }
 0x47a   :  { %956 = vmatmul.mubr.msk.f32.vlgmr.msra.gmra.mrb[4].mxu1 %vm330_vm5, %v326_v50 }
 0x47b   :  { %964 = vmatpush3.msra.mxu1 %v508_v49  ;;  %965 = vmatprep.mubr.msk.f32.mxu1 %vm1149_vm0, %v1150_v1 }
 0x47c   :  { %1029 = vmatprep.subr.bf16.mxu1 %v1148_v0 }
 0x47d   :  { %v506_v51 = vpop.permute.xlu1 %505 }
 0x47e   :  { %966 = vmatmul.mubr.msk.f32.vlgmr.msra.gmra.mrb[6].mxu1 %vm330_vm5, %v506_v51 }
 0x47f   :  { %987 = vmatprep.mubr.msk.f32.mxu1 %vm1149_vm0, %v1150_v1  ;;  %1031 = vmatpush3.bf16.msra.mxu1 %v1030_v2 }
 0x480   :  { %1032 = vmatprep.subr.bf16.mxu1 %v1148_v0 }
 0x48a   :  { %v502_v3 = vpop.permute.xlu0 %501 }
 0x48b   :  { %v504_v5 = vmul.f32 %v502_v3, %v1256_v11 }
 0x48e   :  { %v322_v4 = vpop.permute.xlu1 %321 }
 0x48f   :  { %v324_v9 = vmul.f32 %v322_v4, %v1256_v11  ;;  %v681_v11 = vld [vmem:[%s1368_s4 + $0x18] sm:$0xff] }
 0x490   :  { %v1033_v17 = vpack.c.bf16 %v681_v11, %v680_v16 }
 0x492   :  { %1034 = vmatpush3.bf16.msra.mxu1 %v1033_v17 }
 0x54d   :  { %v399_v57 = vpop.f32.mrb[4].mxu1 }
 0x54e   :  { %404 = vrot.lane.b32.xlu0 %v399_v57, %s1153_s12  ;;  %v957_v59 = vpop.f32.mrb[5].mxu1 }
 0x551   :  { %v578_v60 = vpop.f32.mrb[6].mxu1 }
 0x552   :  { %583 = vrot.lane.b32.xlu1 %v578_v60, %s1153_s12  ;;  %v967_v61 = vpop.f32.mrb[7].mxu1  ;;  %853 = vrot.lane.b32.xlu0 %v885_v18, %s1153_s12 }
 0x5c0   :  { %v405_v6 = vpop.permute.xlu0 %404 }
 0x5c1   :  { %v407_v12 = vadd.f32 %v405_v6, %v324_v9 }
 0x5c4   :  { %v584_v7 = vpop.permute.xlu1 %583  ;;  %v854_v48 = vpop.permute.xlu0 %853 }
 0x5c5   :  { %v586_v10 = vadd.f32 %v584_v7, %v504_v5 }
 0x5c7   :  { %v588_v13 = vrot.slane %v586_v10, 7 }
 0x5c9   :  { %v591_v14 = vsel %vm590_vm6, %v407_v12, %v588_v13 }
 0x5ca   :  { %597 = vrot.lane.b32.xlu1 %v591_v14, %s1153_s12 }
 0x63c   :  { %v598_v15 = vpop.permute.xlu1 %597 }
 0x63d   :  { %977 = vmatmul.mubr.msk.f32.vlgmr.msra.gmra.mrb[4].mxu0 %vm60_vm1, %v598_v15 }
 0x63e   :  { %1006 = vmatprep.mubr.msk.f32.mxu0 %vm1149_vm0, %v1150_v1  ;;  %v674_v1 = vrot.slane %v1247_v8, %v673_v21  ;;  %1037 = vmatpush3.bf16.msra.mxu0 %v1036_v27  ;;  %v772_v8 = vld [vmem:[%s1369_s5 + $0x10] sm:$0xff]  ;;  %s1156_s5 = smov [#allocation7]  }
 0x63f   :  { %1038 = vmatprep.subr.bf16.mxu0 %v1148_v0  ;;  %v1039_v29 = vpack.c.bf16 %v773_v28, %v772_v8  ;;  %s865_s19 = sshll.u32 %s1156_s5, 4  ;;  %s866_s19 = int_to_ptr.vmem [resolvable:$true] %s865_s19 }
 0x640   :  { %s1116_s20 = scalar_lea.vmem %s866_s19, 32  ;;  %p1121_p3 = scmp.lt.s32.totalorder %s866_s19, %s866_s19 }
 0x641   :  { %p1117_p2 = scmp.ne.s32.totalorder %s866_s19, %s1116_s20  ;;  %p1122_p4 = scmp.lt.s32.totalorder %s1116_s20, %s1116_s20 }
 0x642   :  { %1040 = vmatpush3.bf16.msra.mxu0 %v1039_v29 }
 0x643   :  { %1041 = vmatprep.subr.bf16.mxu0 %v1148_v0  ;;  %p1123_p5 = por %p1122_p4, %p1121_p3 }
 0x645   :  { %p1124_p6 = pnand %p1123_p5, %p1117_p2 }
 0x646   :  { %1043 = vmatpush3.bf16.msra.mxu0 %v1042_v32 }
 0x647   :  { %1044 = vmatprep.subr.bf16.mxu0 %v1148_v0 }
 0x64a   :  { %1046 = vmatpush3.bf16.msra.mxu0 %v1045_v35 }
 0x710   :  { %v667_v22 = vpop.f32.mrb[4].mxu0 }
 0x711   :  { %v676_v23 = vadd.f32 %v674_v1, %v667_v22  ;;  %v978_v24 = vpop.f32.mrb[5].mxu0 }
 0x713   :  { %988 = vmatmul.mubr.msk.f32.vlgmr.msra.gmra.mrb[8].mxu1 %vm60_vm1, %v676_v23 }
 0x7e6   :  { %v757_v36 = vpop.f32.mrb[8].mxu1 }
 0x7e7   :  { %v758_v37 = vadd.f32 %v885_v18, %v757_v36  ;;  %v989_v38 = vpop.f32.mrb[9].mxu1 }
 0x7e9   :  { %v761_v39 = vmul.f32 %v758_v37, %v758_v37 }
 0x7eb   :  { %v762_v40 = vmul.f32 %v761_v39, %v758_v37 }
 0x7ed   :  { %v763_v41 = vmul.f32 0.044715, %v762_v40 }
 0x7ef   :  { %v764_v42 = vadd.f32 %v763_v41, %v758_v37 }
 0x7f1   :  { %v765_v43 = vmul.f32 0.7978846, %v764_v42 }
 0x7f3   :  { %1070 = vtanh.f32 %v765_v43 }
 0x7fd   :  { %v1071_v0 = vpop.eup %1070 }
 0x7fe   :  { %v767_v44 = vadd.f32 1.0, %v1071_v0 }
 0x800   :  { %v768_v45 = vmul.f32 0.5, %v767_v44 }
 0x802   :  { %v769_v46 = vmul.f32 %v768_v45, %v758_v37 }
 0x804   :  { %1007 = vmatmul.mubr.msk.f32.vlgmr.msra.gmra.mrb[6].mxu0 %vm778_vm7, %v769_v46 }
 0x8d7   :  { %v848_v47 = vpop.f32.mrb[6].mxu0 }
 0x8d8   :  { %v852_v49 = vadd.f32 %v848_v47, %v676_v23  ;;  %v1008_v50 = vpop.f32.mrb[7].mxu0 }
 0x8da   :  { %v856_v51 = vadd.f32 %v854_v48, %v852_v49 }
 0x8dc   :  { %858 = vst.msk [vmem:[#allocation7] sm:$0x3] %vm857_vm8, %v856_v51 }
 0x8dd   :  { %1127 = shalt.err (!%p1124_p6)
}
 0x8de   :  { %s1128_s23 = scalar_lea.hbm %s1371_s7, 32 }
 0x8df   :  { %p1129_p7 = scmp.ne.s32.totalorder %s1371_s7, %s1128_s23  ;;  %p1132_p8 = scmp.lt.u32.totalorder %s1128_s23, %s1371_s7 }
 0x8e1   :  { %p1134_p9 = pnand %p1132_p8, %p1129_p7 }
 0x8e3   :  { %1137 = shalt.err (!%p1134_p9)
}
 0x8e4   :  { %868 = dma.vmem_to_hbm [thread:$0]  %s866_s19, 32, %s1371_s7, [#allocation4]  }
 0x8e5   :  { %1142 = dma.done.wait [#allocation4], 32  }
 0x8e6   :  { %1143 = vsyncadd [#allocation4], 4294967264 }
 0x8e7   :  { %872 = vsyncpa [#allocation3], 1 }
 0x8e8   :  { %873 = vsyncpa [#allocation6], 1 }
 0x8e9   :  { %874 = vsyncpa [#allocation4], 1 }

</bundles_post_ra>
